<compile_context>
chip_gen: v7x
topology: tpu7x:2x2x1
jax: 0.10.0
libtpu: 0.0.40
codegen_flags: <defaults>
</compile_context>

<pallas_src>
import functools

import jax
import jax.numpy as jnp
from jax.experimental import pallas as pl
from jax.experimental.pallas import tpu as pltpu

E_CHAR = 50   # fixed by the module
KERNEL = 5    # CNN kernel width (a5 default)


def _round_up(x, m):
    return ((x + m - 1) // m) * m


def _char_cnn_highway_kernel(emb_ref, wconv_ref, bconv_ref, wpg_ref, bpg_ref,
                             out_ref, *, n_time):
    """One tile of words.

    emb_ref  : (TN, L_pad*50) bf16  flat char embeddings (lane-dense)
    wconv_ref: (256, E)       bf16  im2col-fused conv weight, rows 250..255 == 0
    bconv_ref: (1, E)         f32
    wpg_ref  : (E, 2E)        bf16  [proj | gate] fused highway weight
    bpg_ref  : (1, 2E)        f32
    out_ref  : (TN, E)        f32
    """
    kwp, E = wconv_ref.shape          # kwp = 256 (padded contraction)
    x = emb_ref[...]                  # (TN, LF) bf16
    w = wconv_ref[...]                # (256, E) bf16

    # Conv + max-over-time as T full-width matmuls with a running maximum.
    # Each window slice is 256 lanes wide; lanes 250..255 carry real (next-char)
    # or pad-char data but hit zero weight rows, so the result is exact.
    pooled = None
    for t in range(n_time):           # static unroll (T = L - K + 1)
        win = x[:, t * E_CHAR: t * E_CHAR + kwp]                # (TN, 256)
        y = jnp.dot(win, w, preferred_element_type=jnp.float32)  # (TN, E) f32
        pooled = y if pooled is None else jnp.maximum(pooled, y)

    # Bias + ReLU (exact hoist past the max: bias time-constant, ReLU monotone).
    pooled = jnp.maximum(pooled + bconv_ref[...], 0.0)

    # Highway: single fused proj|gate matmul, sigmoid kept in f32.
    pg = jnp.dot(pooled.astype(wpg_ref.dtype), wpg_ref[...],
                 preferred_element_type=jnp.float32) + bpg_ref[...]
    proj = jnp.maximum(pg[:, :E], 0.0)
    gate = jax.nn.sigmoid(pg[:, E:])

    # TODO(synk): nn.Dropout(0.3) is eval-mode identity here (training-mode
    # mask would use pltpu.prng_seed / pltpu.prng_random_bits in-kernel).
    out_ref[...] = (pooled + gate * (proj - pooled)).astype(out_ref.dtype)


def _choose_tile_n(n, tile_n):
    """Multiple of 8, capped by tile_n, and (when possible) small enough that
    the grid has >= 2 steps so v7x megacore can shard the word axis."""
    half = -(-n // 2)
    tn = min(tile_n, max(8, _round_up(half, 8)))
    tn = min(tn, _round_up(n, 8))
    return max(8, _round_up(tn, 8))


def char_cnn_highway(emb_flat, w_conv, b_conv, w_pg, b_pg, n_time, tn):
    """emb_flat: (n_pad, L_pad*50) bf16 -> (n_pad, E) f32."""
    n_pad, lf_pad = emb_flat.shape
    kwp, E = w_conv.shape

    # Rough per-step VMEM working set; raise the scoped limit only when needed
    # (big tiles on v5e/v6e). Keep the default otherwise (v7x has 64 MiB/TC).
    vmem_est = (2 * tn * lf_pad * 2            # emb block, bf16, double-buffered
                + 2 * tn * E * 4               # out block, f32, double-buffered
                + (kwp * E + E * 2 * E) * 2    # weights, bf16
                + (E + 2 * E) * 4              # biases, f32
                + tn * kwp * 2 + 4 * tn * E * 4)   # transient window / acc / pg
    vmem_limit = (min(100 * 2**20, 2 * vmem_est)
                  if vmem_est > 24 * 2**20 else None)

    return pl.pallas_call(
        functools.partial(_char_cnn_highway_kernel, n_time=n_time),
        out_shape=jax.ShapeDtypeStruct((n_pad, E), jnp.float32),
        grid=(n_pad // tn,),
        in_specs=[
            pl.BlockSpec((tn, lf_pad), lambda i: (i, 0)),
            pl.BlockSpec((kwp, E), lambda i: (0, 0)),
            pl.BlockSpec((1, E), lambda i: (0, 0)),
            pl.BlockSpec((E, 2 * E), lambda i: (0, 0)),
            pl.BlockSpec((1, 2 * E), lambda i: (0, 0)),
        ],
        out_specs=pl.BlockSpec((tn, E), lambda i: (i, 0)),
        compiler_params=pltpu.CompilerParams(
            dimension_semantics=("parallel",),
            vmem_limit_bytes=vmem_limit),
    )(emb_flat, w_conv, b_conv, w_pg, b_pg)


def model_embeddings_forward(input_ids, kparams, embed_size, *, tile_n=256):
    """(sentence_length, batch, max_word_length) int32 -> (S, B, embed_size) f32."""
    S, B, L = input_ids.shape
    assert L >= KERNEL, "max_word_length must be >= CNN kernel width (5)"
    N = S * B
    T = L - KERNEL + 1
    E = embed_size
    kwp = kparams["conv_w"].shape[0]                     # 256

    # Extra (pad-char) columns so every 256-wide im2col window slice is
    # in-bounds; their contribution is zeroed by the zero weight rows.
    extra_cols = -(-(kwp - KERNEL * E_CHAR) // E_CHAR)   # = 1
    tn = _choose_tile_n(N, tile_n)
    n_pad = _round_up(N, tn)

    # Pad the cheap int32 ids (tail words + window columns), NOT the gathered
    # embedding tensor — avoids an extra full HBM pass over the largest array.
    ids = input_ids.reshape(N, L)
    ids = jnp.pad(ids, ((0, n_pad - N), (0, extra_cols)))

    # Glue: nn.Embedding gather from the bf16 table, straight into the flat
    # lane-dense (n_pad, L_pad*50) layout (contiguous reshape, no copy).
    emb = jnp.take(kparams["embed_table"], ids.reshape(-1), axis=0)
    emb = emb.reshape(n_pad, (L + extra_cols) * E_CHAR)

    out = char_cnn_highway(emb, kparams["conv_w"], kparams["conv_b"],
                           kparams["hwy_w"], kparams["hwy_b"], T, tn)
    return out[:N].reshape(S, B, E)


def init_params(key, vocab_size, embed_size):
    """Canonical f32 parameters mirroring the PyTorch module's layout."""
    ks = jax.random.split(key, 7)
    scale = 0.1
    E = embed_size
    return dict(
        embed_table=scale * jax.random.normal(ks[0], (vocab_size, E_CHAR), jnp.float32),
        conv_w=scale * jax.random.normal(ks[1], (E, E_CHAR, KERNEL), jnp.float32),  # Conv1d (out,in,k)
        conv_b=scale * jax.random.normal(ks[2], (E,), jnp.float32),
        hwy_w_proj=scale * jax.random.normal(ks[3], (E, E), jnp.float32),           # Linear (out,in)
        hwy_b_proj=scale * jax.random.normal(ks[4], (E,), jnp.float32),
        hwy_w_gate=scale * jax.random.normal(ks[5], (E, E), jnp.float32),
        hwy_b_gate=scale * jax.random.normal(ks[6], (E,), jnp.float32),
    )


def prepare_kernel_params(params, embed_size):
    """One-time layout/dtype prep: bf16 embed table, im2col-fused conv weight
    padded to a 256-wide contraction, fused [proj|gate] highway weight."""
    E = embed_size
    kw = KERNEL * E_CHAR                               # 250
    kwp = _round_up(kw, 128)                           # 256
    # Conv1d (E, e_char, K) -> (K, e_char, E) -> (250, E); row j*50+c multiplies
    # the char at window offset j, channel c. Zero-pad rows to 256.
    w = jnp.transpose(params["conv_w"], (2, 1, 0)).reshape(kw, E)
    w_fused = jnp.zeros((kwp, E), jnp.float32).at[:kw].set(w)
    hwy_w = jnp.concatenate(
        [params["hwy_w_proj"].T, params["hwy_w_gate"].T], axis=1)   # (E, 2E)
    hwy_b = jnp.concatenate([params["hwy_b_proj"], params["hwy_b_gate"]])
    return dict(
        embed_table=params["embed_table"].astype(jnp.bfloat16),
        conv_w=w_fused.astype(jnp.bfloat16),
        conv_b=params["conv_b"].reshape(1, E).astype(jnp.float32),
        hwy_w=hwy_w.astype(jnp.bfloat16),
        hwy_b=hwy_b.reshape(1, 2 * E).astype(jnp.float32),
    )


def reference_forward(input_ids, params, embed_size):
    """Pure-JAX f32 reference mirroring the PyTorch module (eval mode)."""
    S, B, L = input_ids.shape
    E = embed_size
    emb = jnp.take(params["embed_table"], input_ids.reshape(-1), axis=0)
    emb = emb.reshape(S * B, L, E_CHAR)
    x_ncl = jnp.transpose(emb, (0, 2, 1))                      # (N, e_char, L)
    conv = jax.lax.conv_general_dilated(
        x_ncl, params["conv_w"], window_strides=(1,), padding="VALID",
        dimension_numbers=("NCH", "OIH", "NCH"))               # (N, E, T)
    conv = jnp.maximum(conv + params["conv_b"][None, :, None], 0.0)
    pooled = jnp.max(conv, axis=-1)                            # (N, E)
    proj = jnp.maximum(pooled @ params["hwy_w_proj"].T + params["hwy_b_proj"], 0.0)
    gate = jax.nn.sigmoid(pooled @ params["hwy_w_gate"].T + params["hwy_b_gate"])
    hwy = gate * proj + (1.0 - gate) * pooled
    return hwy.reshape(S, B, E)


if __name__ == "__main__":
    key = jax.random.PRNGKey(0)
    k_ids, k_params = jax.random.split(key)

    sentence_length, batch, max_word_length = 6, 4, 12
    vocab_size, embed_size = 30, 128

    input_ids = jax.random.randint(
        k_ids, (sentence_length, batch, max_word_length), 0, vocab_size,
        dtype=jnp.int32)
    params = init_params(k_params, vocab_size, embed_size)
    kparams = prepare_kernel_params(params, embed_size)   # one-time prep

    # N=24 with the 2-step tile heuristic -> tn=16, grid of 2, tail padding.
    fwd = jax.jit(functools.partial(model_embeddings_forward,
                                    embed_size=embed_size))
    out = jax.block_until_ready(fwd(input_ids, kparams))

    ref = reference_forward(input_ids, params, embed_size)
    assert out.shape == (sentence_length, batch, embed_size)
    err = float(jnp.max(jnp.abs(out - ref)))
    assert err < 2e-2, f"mismatch vs reference: max abs err {err}"

    print("KERNEL_OK")
</pallas_src>

<mosaic_0001>
module attributes {stable_mosaic.version = 11 : i64} {
  func.func @_char_cnn_highway_kernel(%arg0: i32, %arg1: memref<16x650xbf16, #tpu.memory_space<vmem>>, %arg2: memref<256x128xbf16, #tpu.memory_space<vmem>>, %arg3: memref<1x128xf32, #tpu.memory_space<vmem>>, %arg4: memref<128x256xbf16, #tpu.memory_space<vmem>>, %arg5: memref<1x256xf32, #tpu.memory_space<vmem>>, %arg6: memref<16x128xf32, #tpu.memory_space<vmem>>) attributes {dimension_semantics = [#tpu.dimension_semantics<parallel>], iteration_bounds = array<i64: 2>, scalar_prefetch = 0 : i64, scratch_operands = 0 : i64, tpu.core_type = #tpu.core_type<tc>, window_params = [{transform_indices = @transform_0, window_bounds = array<i64: 16, 650>}, {pipeline_mode = #tpu.pipeline_mode<synchronous>, transform_indices = @transform_1, window_bounds = array<i64: 256, 128>}, {pipeline_mode = #tpu.pipeline_mode<synchronous>, transform_indices = @transform_2, window_bounds = array<i64: 1, 128>}, {pipeline_mode = #tpu.pipeline_mode<synchronous>, transform_indices = @transform_3, window_bounds = array<i64: 128, 256>}, {pipeline_mode = #tpu.pipeline_mode<synchronous>, transform_indices = @transform_4, window_bounds = array<i64: 1, 256>}, {transform_indices = @transform_5, window_bounds = array<i64: 16, 128>}]} {
    %c0 = arith.constant 0 : index
    %c0_0 = arith.constant 0 : index
    %0 = vector.load %arg1[%c0, %c0_0] : memref<16x650xbf16, #tpu.memory_space<vmem>>, vector<16x650xbf16>
    %c0_1 = arith.constant 0 : index
    %c0_2 = arith.constant 0 : index
    %1 = vector.load %arg2[%c0_1, %c0_2] : memref<256x128xbf16, #tpu.memory_space<vmem>>, vector<256x128xbf16>
    %2 = vector.extract_strided_slice %0 {offsets = [0, 0], sizes = [16, 256], strides = [1, 1]} : vector<16x650xbf16> to vector<16x256xbf16>
    %cst = arith.constant dense<0.000000e+00> : vector<16x128xf32>
    %3 = tpu.matmul %2, %1, %cst {dimension_numbers = #tpu.dot_dimension_numbers<[1], [0], [0], [1], [0, 0, 1, 1], [], []>} : vector<16x256xbf16>, vector<256x128xbf16>, vector<16x128xf32> -> vector<16x128xf32>
    %4 = vector.extract_strided_slice %0 {offsets = [0, 50], sizes = [16, 256], strides = [1, 1]} : vector<16x650xbf16> to vector<16x256xbf16>
    %cst_3 = arith.constant dense<0.000000e+00> : vector<16x128xf32>
    %5 = tpu.matmul %4, %1, %cst_3 {dimension_numbers = #tpu.dot_dimension_numbers<[1], [0], [0], [1], [0, 0, 1, 1], [], []>} : vector<16x256xbf16>, vector<256x128xbf16>, vector<16x128xf32> -> vector<16x128xf32>
    %6 = arith.maximumf %3, %5 : vector<16x128xf32>
    %7 = vector.extract_strided_slice %0 {offsets = [0, 100], sizes = [16, 256], strides = [1, 1]} : vector<16x650xbf16> to vector<16x256xbf16>
    %cst_4 = arith.constant dense<0.000000e+00> : vector<16x128xf32>
    %8 = tpu.matmul %7, %1, %cst_4 {dimension_numbers = #tpu.dot_dimension_numbers<[1], [0], [0], [1], [0, 0, 1, 1], [], []>} : vector<16x256xbf16>, vector<256x128xbf16>, vector<16x128xf32> -> vector<16x128xf32>
    %9 = arith.maximumf %6, %8 : vector<16x128xf32>
    %10 = vector.extract_strided_slice %0 {offsets = [0, 150], sizes = [16, 256], strides = [1, 1]} : vector<16x650xbf16> to vector<16x256xbf16>
    %cst_5 = arith.constant dense<0.000000e+00> : vector<16x128xf32>
    %11 = tpu.matmul %10, %1, %cst_5 {dimension_numbers = #tpu.dot_dimension_numbers<[1], [0], [0], [1], [0, 0, 1, 1], [], []>} : vector<16x256xbf16>, vector<256x128xbf16>, vector<16x128xf32> -> vector<16x128xf32>
    %12 = arith.maximumf %9, %11 : vector<16x128xf32>
    %13 = vector.extract_strided_slice %0 {offsets = [0, 200], sizes = [16, 256], strides = [1, 1]} : vector<16x650xbf16> to vector<16x256xbf16>
    %cst_6 = arith.constant dense<0.000000e+00> : vector<16x128xf32>
    %14 = tpu.matmul %13, %1, %cst_6 {dimension_numbers = #tpu.dot_dimension_numbers<[1], [0], [0], [1], [0, 0, 1, 1], [], []>} : vector<16x256xbf16>, vector<256x128xbf16>, vector<16x128xf32> -> vector<16x128xf32>
    %15 = arith.maximumf %12, %14 : vector<16x128xf32>
    %16 = vector.extract_strided_slice %0 {offsets = [0, 250], sizes = [16, 256], strides = [1, 1]} : vector<16x650xbf16> to vector<16x256xbf16>
    %cst_7 = arith.constant dense<0.000000e+00> : vector<16x128xf32>
    %17 = tpu.matmul %16, %1, %cst_7 {dimension_numbers = #tpu.dot_dimension_numbers<[1], [0], [0], [1], [0, 0, 1, 1], [], []>} : vector<16x256xbf16>, vector<256x128xbf16>, vector<16x128xf32> -> vector<16x128xf32>
    %18 = arith.maximumf %15, %17 : vector<16x128xf32>
    %19 = vector.extract_strided_slice %0 {offsets = [0, 300], sizes = [16, 256], strides = [1, 1]} : vector<16x650xbf16> to vector<16x256xbf16>
    %cst_8 = arith.constant dense<0.000000e+00> : vector<16x128xf32>
    %20 = tpu.matmul %19, %1, %cst_8 {dimension_numbers = #tpu.dot_dimension_numbers<[1], [0], [0], [1], [0, 0, 1, 1], [], []>} : vector<16x256xbf16>, vector<256x128xbf16>, vector<16x128xf32> -> vector<16x128xf32>
    %21 = arith.maximumf %18, %20 : vector<16x128xf32>
    %22 = vector.extract_strided_slice %0 {offsets = [0, 350], sizes = [16, 256], strides = [1, 1]} : vector<16x650xbf16> to vector<16x256xbf16>
    %cst_9 = arith.constant dense<0.000000e+00> : vector<16x128xf32>
    %23 = tpu.matmul %22, %1, %cst_9 {dimension_numbers = #tpu.dot_dimension_numbers<[1], [0], [0], [1], [0, 0, 1, 1], [], []>} : vector<16x256xbf16>, vector<256x128xbf16>, vector<16x128xf32> -> vector<16x128xf32>
    %24 = arith.maximumf %21, %23 : vector<16x128xf32>
    %c0_10 = arith.constant 0 : index
    %c0_11 = arith.constant 0 : index
    %25 = vector.load %arg3[%c0_10, %c0_11] : memref<1x128xf32, #tpu.memory_space<vmem>>, vector<1x128xf32>
    %26 = vector.broadcast %25 : vector<1x128xf32> to vector<16x128xf32>
    %27 = arith.addf %24, %26 : vector<16x128xf32>
    %cst_12 = arith.constant 0.000000e+00 : f32
    %28 = vector.broadcast %cst_12 : f32 to vector<16x128xf32>
    %29 = arith.maximumf %27, %28 : vector<16x128xf32>
    %30 = arith.truncf %29 : vector<16x128xf32> to vector<16x128xbf16>
    %c0_13 = arith.constant 0 : index
    %c0_14 = arith.constant 0 : index
    %31 = vector.load %arg4[%c0_13, %c0_14] : memref<128x256xbf16, #tpu.memory_space<vmem>>, vector<128x256xbf16>
    %cst_15 = arith.constant dense<0.000000e+00> : vector<16x256xf32>
    %32 = tpu.matmul %30, %31, %cst_15 {dimension_numbers = #tpu.dot_dimension_numbers<[1], [0], [0], [1], [0, 0, 1, 1], [], []>} : vector<16x128xbf16>, vector<128x256xbf16>, vector<16x256xf32> -> vector<16x256xf32>
    %c0_16 = arith.constant 0 : index
    %c0_17 = arith.constant 0 : index
    %33 = vector.load %arg5[%c0_16, %c0_17] : memref<1x256xf32, #tpu.memory_space<vmem>>, vector<1x256xf32>
    %34 = vector.broadcast %33 : vector<1x256xf32> to vector<16x256xf32>
    %35 = arith.addf %32, %34 : vector<16x256xf32>
    %36 = vector.extract_strided_slice %35 {offsets = [0, 0], sizes = [16, 128], strides = [1, 1]} : vector<16x256xf32> to vector<16x128xf32>
    %cst_18 = arith.constant 0.000000e+00 : f32
    %37 = vector.broadcast %cst_18 : f32 to vector<16x128xf32>
    %38 = arith.maximumf %36, %37 : vector<16x128xf32>
    %39 = vector.extract_strided_slice %35 {offsets = [0, 128], sizes = [16, 128], strides = [1, 1]} : vector<16x256xf32> to vector<16x128xf32>
    %40 = arith.negf %39 : vector<16x128xf32>
    %41 = math.exp %40 : vector<16x128xf32>
    %cst_19 = arith.constant 1.000000e+00 : f32
    %42 = vector.broadcast %cst_19 : f32 to vector<16x128xf32>
    %43 = arith.addf %42, %41 : vector<16x128xf32>
    %44 = arith.divf %42, %43 : vector<16x128xf32>
    %45 = arith.subf %38, %29 : vector<16x128xf32>
    %46 = arith.mulf %44, %45 : vector<16x128xf32>
    %47 = arith.addf %29, %46 : vector<16x128xf32>
    %c0_20 = arith.constant 0 : index
    %c0_21 = arith.constant 0 : index
    %48 = vector.load %arg6[%c0_20, %c0_21] : memref<16x128xf32, #tpu.memory_space<vmem>>, vector<16x128xf32>
    tpu.vector_store %arg6[%c0_20, %c0_21], %47 {strides = array<i32>} : memref<16x128xf32, #tpu.memory_space<vmem>>, vector<16x128xf32>,
    return
  }
  func.func @transform_0(%arg0: i32) -> (i32, i32) {
    %c0_i32 = arith.constant 0 : i32
    %c0_i32_0 = arith.constant 0 : i32
    return %arg0, %c0_i32 : i32, i32
  }
  func.func @transform_1(%arg0: i32) -> (i32, i32) {
    %c0_i32 = arith.constant 0 : i32
    %c0_i32_0 = arith.constant 0 : i32
    %c0_i32_1 = arith.constant 0 : i32
    return %c0_i32, %c0_i32_0 : i32, i32
  }
  func.func @transform_2(%arg0: i32) -> (i32, i32) {
    %c0_i32 = arith.constant 0 : i32
    %c0_i32_0 = arith.constant 0 : i32
    %c0_i32_1 = arith.constant 0 : i32
    return %c0_i32, %c0_i32_0 : i32, i32
  }
  func.func @transform_3(%arg0: i32) -> (i32, i32) {
    %c0_i32 = arith.constant 0 : i32
    %c0_i32_0 = arith.constant 0 : i32
    %c0_i32_1 = arith.constant 0 : i32
    return %c0_i32, %c0_i32_0 : i32, i32
  }
  func.func @transform_4(%arg0: i32) -> (i32, i32) {
    %c0_i32 = arith.constant 0 : i32
    %c0_i32_0 = arith.constant 0 : i32
    %c0_i32_1 = arith.constant 0 : i32
    return %c0_i32, %c0_i32_0 : i32, i32
  }
  func.func @transform_5(%arg0: i32) -> (i32, i32) {
    %c0_i32 = arith.constant 0 : i32
    %c0_i32_0 = arith.constant 0 : i32
    return %arg0, %c0_i32 : i32, i32
  }
}

</mosaic_0001>

<bundles_post_ra>
// kernel: model_embeddings_forward.1
= control target key start
LH: loop header
LB: loop body
LE: loop exit
PB: predicated region body
PF: predicated region fallthrough
CT: control target
= control target key end

     0   :  { %s1394_s18 = smov 0   ;;  %s1711_s0 = inlined_call_operand.vmem [shape: bf16[32,650], index: 0, kind: input, shape index: {}]   ;;  %s1712_s1 = inlined_call_operand.vmem [shape: bf16[256,128], index: 1, kind: input, shape index: {}]   ;;  %s1713_s2 = inlined_call_operand.vmem [shape: f32[1,128], index: 2, kind: input, shape index: {}]   ;;  %s1714_s3 = inlined_call_operand.vmem [shape: bf16[128,256], index: 3, kind: input, shape index: {}]   ;;  %s1715_s4 = inlined_call_operand.vmem [shape: f32[1,256], index: 4, kind: input, shape index: {}]   ;;  %s1716_s5 = inlined_call_operand.vmem [shape: f32[32,128], index: 5, kind: output, shape index: {}]  }
   0x1 LB: > { %s1049_s19 = sadd.s32 4294967295, %s1354_s18   ;;  %p1053_p0 = scmp.ge.s32.totalorder %s1354_s18, 1  ;;  %s1354_s18 = sphi %s1394_s18, %s15_s18  }
   0x2   : > { %p189_p1 = scmp.lt.s32.totalorder %s1354_s18, 3 }
   0x4   : > { %p190_p2 = pnand %p1053_p0, %p189_p1 }
   0x5   : > { %s1054_s20 = sshll.u32 (!%p190_p2), %s1049_s19, 1  ;;  %v1405_v0 = vld [vmem:[%s1712_s1 + $0x40] sm:$0xff] (!%p190_p2)   ;;  %v1418_v2 = vld [vmem:[%s1712_s1 + $0x48] sm:$0xff] (!%p190_p2)   ;;  %v1433_v4 = vld [vmem:[%s1712_s1 + $0x50] sm:$0xff] (!%p190_p2)   ;;  %s1356_s14 = smov (!%p190_p2), 78   ;;  %vm428_vm0 = vcmask (!%p190_p2), 637952  }
   0x6   : > { %193 = sbr.rel (%p190_p2) target bundleno = 708 (0x2c4), region = 40  ;;  %p219_p3 = scmp.lt.s32.totalorder (!%p190_p2), %s1054_s20, 3  ;;  %v1410_v1 = vld [vmem:[%s1712_s1] sm:$0xff] (!%p190_p2)   ;;  %1100 = vmatprep.subr.bf16.mxu0 (!%p190_p2), %v1405_v0  ;;  %1122 = vmatprep.subr.bf16.mxu1 (!%p190_p2), %v1405_v0  ;;  %v1425_v3 = vld [vmem:[%s1712_s1 + $0x8] sm:$0xff] (!%p190_p2)   ;;  %v1439_v5 = vld [vmem:[%s1712_s1 + $0x10] sm:$0xff] (!%p190_p2)   ;;  %vm482_vm1 = vcmask (!%p190_p2), 228352  }
   0x7   : > { %1101 = vmatpush3.bf16.msra.mxu0 (!%p190_p2), %v1410_v1  ;;  %1123 = vmatpush3.bf16.msra.mxu1 (!%p190_p2), %v1410_v1  ;;  %v1449_v6 = vld [vmem:[%s1712_s1 + $0x58] sm:$0xff] (!%p190_p2)   ;;  %v1475_v11 = vld [vmem:[%s1712_s1 + $0x60] sm:$0xff] (!%p190_p2)   ;;  %s1357_s21 = smov (!%p190_p2), 28   ;;  %v1491_v13 = vld [vmem:[%s1712_s1 + $0x68] sm:$0xff] (!%p190_p2)   ;;  %s1358_s30 = smov (!%p190_p2), 106   ;;  %vm539_vm2 = vcmask (!%p190_p2), 867328  }
   0x8   : > { %1102 = vmatprep.subr.bf16.mxu0 (!%p190_p2), %v1418_v2  ;;  %1124 = vmatprep.subr.bf16.mxu1 (!%p190_p2), %v1418_v2  ;;  %v1468_v10 = vld [vmem:[%s1712_s1 + $0x18] sm:$0xff] (!%p190_p2)   ;;  %v1484_v12 = vld [vmem:[%s1712_s1 + $0x20] sm:$0xff] (!%p190_p2)   ;;  %v1499_v15 = vld [vmem:[%s1712_s1 + $0x28] sm:$0xff] (!%p190_p2)   ;;  %s1359_s10 = smov (!%p190_p2), 56   ;;  %s1361_s15 = smov (!%p190_p2), 84   ;;  %vm593_vm3 = vcmask (!%p190_p2), 457728  }
   0x9   : > { %v1505_v16 = vld [vmem:[%s1712_s1 + $0x70] sm:$0xff] (!%p190_p2)   ;;  %v1522_v18 = vld [vmem:[%s1712_s1 + $0x78] sm:$0xff] (!%p190_p2)   ;;  %s1362_s16 = smov (!%p190_p2), 34   ;;  %vm647_vm4 = vcmask (!%p190_p2), 48128   ;;  %vm706_vm5 = vcmask (!%p190_p2), 687104   ;;  %vm760_vm6 = vcmask (!%p190_p2), 277504  }
   0xa   : > { %v1514_v17 = vld [vmem:[%s1712_s1 + $0x30] sm:$0xff] (!%p190_p2)   ;;  %v1531_v19 = vld [vmem:[%s1712_s1 + $0x38] sm:$0xff] (!%p190_p2)   ;;  %v1316_v62 = vld [vmem:[%s1714_s3] ss:$8 sps:$4 sm:$0xff] (!%p190_p2)  }
   0xb   : > { %1103 = vmatpush3.bf16.msra.mxu0 (!%p190_p2), %v1425_v3  ;;  %1125 = vmatpush3.bf16.msra.mxu1 (!%p190_p2), %v1425_v3  ;;  %v1318_v63 = vld [vmem:[%s1714_s3 + $0x4] ss:$8 sps:$4 sm:$0xff] (!%p190_p2)  }
   0xc   : > { %1104 = vmatprep.subr.bf16.mxu0 (!%p190_p2), %v1433_v4  ;;  %1126 = vmatprep.subr.bf16.mxu1 (!%p190_p2), %v1433_v4 }
   0xd   : > { %s1718_s20 = smov (!%p219_p3, %s1054_s20), 3 }
   0xe   : > { %s1276_s29 = smul.u32 24, %s1718_s20  ;;  %s1057_s6 = sshll.u32 %s1718_s20, 3 }
   0xf   : > { %1105 = vmatpush3.bf16.msra.mxu0 %v1439_v5  ;;  %1127 = vmatpush3.bf16.msra.mxu1 %v1439_v5  ;;  %s229_s9 = scalar_lea.vmem %s1716_s5, %s1057_s6 }
  0x10   : > { %s1444_s11 = scalar_lea.vmem %s1711_s0, %s1276_s29  ;;  %1106 = vmatprep.subr.bf16.mxu0 %v1449_v6  ;;  %1128 = vmatprep.subr.bf16.mxu1 %v1449_v6 }
  0x11   : > { %v1452_v7 = vld [vmem:[%s1444_s11 + $0x4] ss:$24 sps:$4 sm:$0xff]   ;;  %v1295_v8 = vld [vmem:[%s1444_s11] ss:$24 sps:$4 sm:$0xff]   ;;  %v1305_v20 = vld [vmem:[%s1444_s11 + $0x10] ss:$24 sps:$4 sm:$0xff]  }
  0x12   : > { %424 = vrot.lane.b32.xlu0 %v1452_v7, %s1356_s14  ;;  %v1461_v9 = vld [vmem:[%s1444_s11 + $0x8] ss:$24 sps:$4 sm:$0xff]   ;;  %408 = vmatprep.mubr.bf16.mxu0 %v1452_v7  ;;  %v1298_v14 = vld [vmem:[%s1444_s11 + $0xc] ss:$24 sps:$4 sm:$0xff]  }
  0x13   : > { %422 = vrot.lane.b32.xlu1 %v1295_v8, %s1356_s14  ;;  %1107 = vmatpush3.bf16.msra.mxu0 %v1468_v10 }
  0x14   : > { %1129 = vmatpush3.bf16.msra.mxu1 %v1468_v10  ;;  %1108 = vmatprep.subr.bf16.mxu0 %v1475_v11 }
  0x15   : > { %1130 = vmatprep.subr.bf16.mxu1 %v1475_v11 }
  0x16   : > { %426 = vrot.lane.b32.xlu0 %v1461_v9, %s1356_s14  ;;  %s1360_s14 = smov 6  }
  0x17   : > { %478 = vrot.lane.b32.xlu1 %v1452_v7, %s1357_s21  ;;  %1109 = vmatpush3.bf16.msra.mxu0 %v1484_v12 }
  0x18   : > { %1131 = vmatpush3.bf16.msra.mxu1 %v1484_v12  ;;  %1110 = vmatprep.subr.bf16.mxu0 %v1491_v13 }
  0x19   : > { %1132 = vmatprep.subr.bf16.mxu1 %v1491_v13 }
  0x1a   : > { %480 = vrot.lane.b32.xlu0 %v1461_v9, %s1357_s21 }
  0x1b   : > { %476 = vrot.lane.b32.xlu1 %v1295_v8, %s1357_s21  ;;  %1111 = vmatpush3.bf16.msra.mxu0 %v1499_v15 }
  0x1c   : > { %1133 = vmatpush3.bf16.msra.mxu1 %v1499_v15  ;;  %1112 = vmatprep.subr.bf16.mxu0 %v1505_v16 }
  0x1d   : > { %1134 = vmatprep.subr.bf16.mxu1 %v1505_v16 }
  0x1e   : > { %535 = vrot.lane.b32.xlu0 %v1461_v9, %s1358_s30 }
  0x1f   : > { %537 = vrot.lane.b32.xlu1 %v1298_v14, %s1358_s30  ;;  %1113 = vmatpush3.bf16.msra.mxu0 %v1514_v17 }
  0x20   : > { %1135 = vmatpush3.bf16.msra.mxu1 %v1514_v17  ;;  %1114 = vmatprep.subr.bf16.mxu0 %v1522_v18 }
  0x21   : > { %1136 = vmatprep.subr.bf16.mxu1 %v1522_v18 }
  0x22   : > { %533 = vrot.lane.b32.xlu0 %v1452_v7, %s1358_s30 }
  0x23   : > { %589 = vrot.lane.b32.xlu1 %v1461_v9, %s1359_s10  ;;  %1115 = vmatpush3.bf16.msra.mxu0 %v1531_v19 }
  0x24   : > { %1137 = vmatpush3.bf16.msra.mxu1 %v1531_v19  ;;  %1144 = vmatprep.subr.bf16.mxu0 %v1405_v0 }
  0x25   : > { %1166 = vmatprep.subr.bf16.mxu1 %v1405_v0 }
  0x26   : > { %591 = vrot.lane.b32.xlu0 %v1298_v14, %s1359_s10  ;;  %409 = vmatmul.mubr.bf16.vlgmr.msra.gmra.mrb[0].mxu0 %v1295_v8  ;;  %v1333_v8 = vld [vmem:[%s1714_s3 + $0x54] ss:$8 sps:$4 sm:$0xff]  }
  0x27   : > { %587 = vrot.lane.b32.xlu1 %v1452_v7, %s1359_s10  ;;  %1145 = vmatpush3.bf16.msra.mxu0 %v1410_v1 }
  0x28   : > { %1146 = vmatprep.subr.bf16.mxu0 %v1418_v2 }
  0x2a   : > { %643 = vrot.lane.b32.xlu0 %v1461_v9, %s1360_s14 }
  0x2b   : > { %645 = vrot.lane.b32.xlu1 %v1298_v14, %s1360_s14  ;;  %1147 = vmatpush3.bf16.msra.mxu0 %v1425_v3 }
  0x2c   : > { %1148 = vmatprep.subr.bf16.mxu0 %v1433_v4 }
  0x2e   : > { %641 = vrot.lane.b32.xlu0 %v1452_v7, %s1360_s14  ;;  %v1328_v7 = vld [vmem:[%s1714_s3 + $0x40] ss:$8 sps:$4 sm:$0xff]  }
  0x2f   : > { %702 = vrot.lane.b32.xlu1 %v1298_v14, %s1361_s15  ;;  %1149 = vmatpush3.bf16.msra.mxu0 %v1439_v5 }
  0x30   : > { %1150 = vmatprep.subr.bf16.mxu0 %v1449_v6 }
  0x32   : > { %704 = vrot.lane.b32.xlu0 %v1305_v20, %s1361_s15 }
  0x33   : > { %700 = vrot.lane.b32.xlu1 %v1461_v9, %s1361_s15  ;;  %1151 = vmatpush3.bf16.msra.mxu0 %v1468_v10 }
  0x34   : > { %1152 = vmatprep.subr.bf16.mxu0 %v1475_v11 }
  0x36   : > { %756 = vrot.lane.b32.xlu0 %v1298_v14, %s1362_s16  ;;  %v1363_v14 = vmov 0  }
  0x37   : > { %758 = vrot.lane.b32.xlu1 %v1305_v20, %s1362_s16  ;;  %1153 = vmatpush3.bf16.msra.mxu0 %v1484_v12 }
  0x38   : > { %1154 = vmatprep.subr.bf16.mxu0 %v1491_v13 }
  0x3a   : > { %754 = vrot.lane.b32.xlu0 %v1461_v9, %s1362_s16  ;;  %v1331_v9 = vld [vmem:[%s1714_s3 + $0x50] ss:$8 sps:$4 sm:$0xff]  }
  0x3b   : > { %1155 = vmatpush3.bf16.msra.mxu0 %v1499_v15 }
  0x3c   : > { %1156 = vmatprep.subr.bf16.mxu0 %v1505_v16 }
  0x3f   : > { %1157 = vmatpush3.bf16.msra.mxu0 %v1514_v17 }
  0x40   : > { %1158 = vmatprep.subr.bf16.mxu0 %v1522_v18 }
  0x43   : > { %1159 = vmatpush3.bf16.msra.mxu0 %v1531_v19 }
  0x44   : > { %1188 = vmatprep.subr.bf16.mxu0 %v1405_v0 }
  0x84   : > { %v425_v21 = vpop.permute.xlu0 %424 }
  0x85   : > { %v423_v22 = vpop.permute.xlu1 %422 }
  0x86   : > { %v429_v26 = vsel %vm428_vm0, %v423_v22, %v425_v21 }
  0x88   : > { %v427_v23 = vpop.permute.xlu0 %426 }
  0x89   : > { %v479_v24 = vpop.permute.xlu1 %478  ;;  %v430_v25 = vsel %vm428_vm0, %v425_v21, %v427_v23 }
  0x8a   : > { %465 = vmatprep.mubr.bf16.mxu1 %v430_v25 }
  0x8b   : > { %466 = vmatmul.mubr.bf16.vlgmr.msra.gmra.mrb[0].mxu1 %v429_v26 }
  0x8c   : > { %1167 = vmatpush3.bf16.msra.mxu1 %v1410_v1  ;;  %v481_v27 = vpop.permute.xlu0 %480 }
  0x8d   : > { %v477_v28 = vpop.permute.xlu1 %476  ;;  %v484_v29 = vsel %vm482_vm1, %v479_v24, %v481_v27  ;;  %1168 = vmatprep.subr.bf16.mxu1 %v1418_v2 }
  0x8e   : > { %v483_v30 = vsel %vm482_vm1, %v477_v28, %v479_v24  ;;  %519 = vmatprep.mubr.bf16.mxu0 %v484_v29 }
  0x8f   : > { %520 = vmatmul.mubr.bf16.vlgmr.msra.gmra.mrb[4].mxu0 %v483_v30 }
  0x90   : > { %1169 = vmatpush3.bf16.msra.mxu1 %v1425_v3  ;;  %1189 = vmatpush3.bf16.msra.mxu0 %v1410_v1  ;;  %v536_v31 = vpop.permute.xlu0 %535 }
  0x91   : > { %1170 = vmatprep.subr.bf16.mxu1 %v1433_v4  ;;  %1190 = vmatprep.subr.bf16.mxu0 %v1418_v2  ;;  %v538_v32 = vpop.permute.xlu1 %537 }
  0x92   : > { %v541_v33 = vsel %vm539_vm2, %v536_v31, %v538_v32 }
  0x93   : > { %576 = vmatprep.mubr.bf16.mxu1 %v541_v33 }
  0x94   : > { %1171 = vmatpush3.bf16.msra.mxu1 %v1439_v5  ;;  %1191 = vmatpush3.bf16.msra.mxu0 %v1425_v3  ;;  %v534_v34 = vpop.permute.xlu0 %533 }
  0x95   : > { %1172 = vmatprep.subr.bf16.mxu1 %v1449_v6  ;;  %1192 = vmatprep.subr.bf16.mxu0 %v1433_v4  ;;  %v590_v35 = vpop.permute.xlu1 %589  ;;  %v540_v42 = vsel %vm539_vm2, %v534_v34, %v536_v31 }
  0x98   : > { %1173 = vmatpush3.bf16.msra.mxu1 %v1468_v10  ;;  %1193 = vmatpush3.bf16.msra.mxu0 %v1439_v5  ;;  %v592_v36 = vpop.permute.xlu0 %591 }
  0x99   : > { %1174 = vmatprep.subr.bf16.mxu1 %v1475_v11  ;;  %1194 = vmatprep.subr.bf16.mxu0 %v1449_v6  ;;  %v595_v37 = vsel %vm593_vm3, %v590_v35, %v592_v36  ;;  %v588_v39 = vpop.permute.xlu1 %587 }
  0x9a   : > { %630 = vmatprep.mubr.bf16.mxu0 %v595_v37  ;;  %v594_v44 = vsel %vm593_vm3, %v588_v39, %v590_v35 }
  0x9c   : > { %1175 = vmatpush3.bf16.msra.mxu1 %v1484_v12  ;;  %1195 = vmatpush3.bf16.msra.mxu0 %v1468_v10  ;;  %v644_v38 = vpop.permute.xlu0 %643 }
  0x9d   : > { %1176 = vmatprep.subr.bf16.mxu1 %v1491_v13  ;;  %1196 = vmatprep.subr.bf16.mxu0 %v1475_v11  ;;  %v646_v40 = vpop.permute.xlu1 %645 }
  0x9e   : > { %v649_v43 = vsel %vm647_vm4, %v644_v38, %v646_v40 }
  0xa0   : > { %1177 = vmatpush3.bf16.msra.mxu1 %v1499_v15  ;;  %1197 = vmatpush3.bf16.msra.mxu0 %v1484_v12  ;;  %v642_v41 = vpop.permute.xlu0 %641 }
  0xa1   : > { %1178 = vmatprep.subr.bf16.mxu1 %v1505_v16  ;;  %1198 = vmatprep.subr.bf16.mxu0 %v1491_v13  ;;  %v703_v46 = vpop.permute.xlu1 %702  ;;  %v648_v51 = vsel %vm647_vm4, %v642_v41, %v644_v38 }
  0xa4   : > { %1179 = vmatpush3.bf16.msra.mxu1 %v1514_v17  ;;  %1199 = vmatpush3.bf16.msra.mxu0 %v1499_v15  ;;  %v705_v45 = vpop.permute.xlu0 %704 }
  0xa5   : > { %1180 = vmatprep.subr.bf16.mxu1 %v1522_v18  ;;  %1200 = vmatprep.subr.bf16.mxu0 %v1505_v16  ;;  %v708_v47 = vsel %vm706_vm5, %v703_v46, %v705_v45  ;;  %v701_v48 = vpop.permute.xlu1 %700 }
  0xa6   : > { %v707_v53 = vsel %vm706_vm5, %v701_v48, %v703_v46 }
  0xa8   : > { %1181 = vmatpush3.bf16.msra.mxu1 %v1531_v19  ;;  %1201 = vmatpush3.bf16.msra.mxu0 %v1514_v17  ;;  %v757_v50 = vpop.permute.xlu0 %756 }
  0xa9   : > { %1202 = vmatprep.subr.bf16.mxu0 %v1522_v18  ;;  %1210 = vmatprep.subr.bf16.mxu1 %v1405_v0  ;;  %v759_v49 = vpop.permute.xlu1 %758 }
  0xaa   : > { %v762_v52 = vsel %vm760_vm6, %v757_v50, %v759_v49 }
  0xab   : > { %577 = vmatmul.mubr.bf16.vlgmr.msra.gmra.mrb[4].mxu1 %v540_v42 }
  0xac   : > { %1203 = vmatpush3.bf16.msra.mxu0 %v1531_v19  ;;  %1211 = vmatpush3.bf16.msra.mxu1 %v1410_v1  ;;  %v755_v54 = vpop.permute.xlu0 %754 }
  0xad   : > { %1212 = vmatprep.subr.bf16.mxu1 %v1418_v2  ;;  %1232 = vmatprep.subr.bf16.mxu0 %v1405_v0  ;;  %v761_v55 = vsel %vm760_vm6, %v755_v54, %v757_v50 }
  0xae   : > { %684 = vmatprep.mubr.bf16.mxu1 %v649_v43 }
  0xaf   : > { %631 = vmatmul.mubr.bf16.vlgmr.msra.gmra.mrb[8].mxu0 %v594_v44 }
  0xb0   : > { %1213 = vmatpush3.bf16.msra.mxu1 %v1425_v3  ;;  %1233 = vmatpush3.bf16.msra.mxu0 %v1410_v1 }
  0xb1   : > { %1214 = vmatprep.subr.bf16.mxu1 %v1433_v4  ;;  %1234 = vmatprep.subr.bf16.mxu0 %v1418_v2 }
  0xb2   : > { %743 = vmatprep.mubr.bf16.mxu0 %v708_v47 }
  0xb4   : > { %1215 = vmatpush3.bf16.msra.mxu1 %v1439_v5  ;;  %1235 = vmatpush3.bf16.msra.mxu0 %v1425_v3 }
  0xb5   : > { %1216 = vmatprep.subr.bf16.mxu1 %v1449_v6  ;;  %1236 = vmatprep.subr.bf16.mxu0 %v1433_v4 }
  0xb8   : > { %1217 = vmatpush3.bf16.msra.mxu1 %v1468_v10  ;;  %1237 = vmatpush3.bf16.msra.mxu0 %v1439_v5 }
  0xb9   : > { %1218 = vmatprep.subr.bf16.mxu1 %v1475_v11  ;;  %1238 = vmatprep.subr.bf16.mxu0 %v1449_v6 }
  0xbc   : > { %1219 = vmatpush3.bf16.msra.mxu1 %v1484_v12  ;;  %1239 = vmatpush3.bf16.msra.mxu0 %v1468_v10 }
  0xbd   : > { %1220 = vmatprep.subr.bf16.mxu1 %v1491_v13  ;;  %1240 = vmatprep.subr.bf16.mxu0 %v1475_v11 }
  0xc0   : > { %1221 = vmatpush3.bf16.msra.mxu1 %v1499_v15  ;;  %1241 = vmatpush3.bf16.msra.mxu0 %v1484_v12 }
  0xc1   : > { %1222 = vmatprep.subr.bf16.mxu1 %v1505_v16  ;;  %1242 = vmatprep.subr.bf16.mxu0 %v1491_v13 }
  0xc4   : > { %1223 = vmatpush3.bf16.msra.mxu1 %v1514_v17  ;;  %1243 = vmatpush3.bf16.msra.mxu0 %v1499_v15 }
  0xc5   : > { %1224 = vmatprep.subr.bf16.mxu1 %v1522_v18  ;;  %1244 = vmatprep.subr.bf16.mxu0 %v1505_v16 }
  0xc8   : > { %1225 = vmatpush3.bf16.msra.mxu1 %v1531_v19  ;;  %1245 = vmatpush3.bf16.msra.mxu0 %v1514_v17 }
  0xc9   : > { %1246 = vmatprep.subr.bf16.mxu0 %v1522_v18  ;;  %1254 = vmatprep.subr.bf16.mxu1 %v1405_v0  ;;  %v1321_v0 = vld [vmem:[%s1714_s3 + $0x14] ss:$8 sps:$4 sm:$0xff]  }
  0xcb   : > { %685 = vmatmul.mubr.bf16.vlgmr.msra.gmra.mrb[8].mxu1 %v648_v51 }
  0xcc   : > { %1247 = vmatpush3.bf16.msra.mxu0 %v1531_v19  ;;  %1255 = vmatpush3.bf16.msra.mxu1 %v1410_v1  ;;  %v1319_v1 = vld [vmem:[%s1714_s3 + $0x10] ss:$8 sps:$4 sm:$0xff]  }
  0xcd   : > { %1256 = vmatprep.subr.bf16.mxu1 %v1418_v2  ;;  %797 = vmatprep.mubr.bf16.mxu1 %v762_v52  ;;  %v1324_v2 = vld [vmem:[%s1714_s3 + $0x24] ss:$8 sps:$4 sm:$0xff]  }
  0xce   : > { %928 = vmatprep.subr.bf16.mxu0 %v1318_v63 }
  0xcf   : > { %744 = vmatmul.mubr.bf16.vlgmr.msra.gmra.mrb[12].mxu0 %v707_v53 }
  0xd0   : > { %1257 = vmatpush3.bf16.msra.mxu1 %v1425_v3  ;;  %929 = vmatpush1.bf16.msra.mxu0 %v1316_v62  ;;  %v1322_v3 = vld [vmem:[%s1714_s3 + $0x20] ss:$8 sps:$4 sm:$0xff]  }
  0xd1   : > { %1258 = vmatprep.subr.bf16.mxu1 %v1433_v4  ;;  %930 = vmatprep.subr.bf16.mxu0 %v1321_v0  ;;  %v1327_v4 = vld [vmem:[%s1714_s3 + $0x34] ss:$8 sps:$4 sm:$0xff]  }
  0xd2   : > { %960 = vmatprep.mubr.bf16.mxu0 %v1363_v14 }
  0xd4   : > { %1259 = vmatpush3.bf16.msra.mxu1 %v1439_v5  ;;  %931 = vmatpush1.bf16.msra.mxu0 %v1319_v1  ;;  %v1325_v5 = vld [vmem:[%s1714_s3 + $0x30] ss:$8 sps:$4 sm:$0xff]  }
  0xd5   : > { %1260 = vmatprep.subr.bf16.mxu1 %v1449_v6  ;;  %932 = vmatprep.subr.bf16.mxu0 %v1324_v2  ;;  %v1330_v6 = vld [vmem:[%s1714_s3 + $0x44] ss:$8 sps:$4 sm:$0xff]  }
  0xd8   : > { %1261 = vmatpush3.bf16.msra.mxu1 %v1468_v10  ;;  %933 = vmatpush1.bf16.msra.mxu0 %v1322_v3  ;;  %v1336_v10 = vld [vmem:[%s1714_s3 + $0x64] ss:$8 sps:$4 sm:$0xff]   ;;  %v1079_v3 = vld [vmem:[%s1713_s2] ss:$0 sm:$0xff] }
  0xd9   : > { %1262 = vmatprep.subr.bf16.mxu1 %v1475_v11  ;;  %934 = vmatprep.subr.bf16.mxu0 %v1327_v4  ;;  %v1334_v11 = vld [vmem:[%s1714_s3 + $0x60] ss:$8 sps:$4 sm:$0xff]  }
  0xdc   : > { %1263 = vmatpush3.bf16.msra.mxu1 %v1484_v12  ;;  %935 = vmatpush1.bf16.msra.mxu0 %v1325_v5  ;;  %v1339_v12 = vld [vmem:[%s1714_s3 + $0x74] ss:$8 sps:$4 sm:$0xff]  }
  0xdd   : > { %1264 = vmatprep.subr.bf16.mxu1 %v1491_v13  ;;  %936 = vmatprep.subr.bf16.mxu0 %v1330_v6  ;;  %v1337_v13 = vld [vmem:[%s1714_s3 + $0x70] ss:$8 sps:$4 sm:$0xff]  }
  0xe0   : > { %1265 = vmatpush3.bf16.msra.mxu1 %v1499_v15  ;;  %937 = vmatpush1.bf16.msra.mxu0 %v1328_v7 }
  0xe1   : > { %1266 = vmatprep.subr.bf16.mxu1 %v1505_v16  ;;  %938 = vmatprep.subr.bf16.mxu0 %v1333_v8 }
  0xe4   : > { %1267 = vmatpush3.bf16.msra.mxu1 %v1514_v17  ;;  %939 = vmatpush1.bf16.msra.mxu0 %v1331_v9 }
  0xe5   : > { %1268 = vmatprep.subr.bf16.mxu1 %v1522_v18  ;;  %940 = vmatprep.subr.bf16.mxu0 %v1336_v10 }
  0xe8   : > { %1269 = vmatpush3.bf16.msra.mxu1 %v1531_v19  ;;  %941 = vmatpush1.bf16.msra.mxu0 %v1334_v11 }
  0xe9   : > { %942 = vmatprep.subr.bf16.mxu0 %v1339_v12 }
  0xeb   : > { %798 = vmatmul.mubr.bf16.vlgmr.msra.gmra.mrb[12].mxu1 %v761_v55 }
  0xec   : > { %943 = vmatpush1.bf16.msra.mxu0 %v1337_v13  ;;  %v838_v13 = vlaneseq }
  0xee   : > { %v839_v14 = vshrl.u32 %v838_v13, 7 }
  0xf9   : > { %v1116_v56 = vpop.f32.mrb[0].mxu0 }
  0xfa   : > { %v1117_v57 = vpop.f32.mrb[1].mxu0 }
  0xfb   : > { %v1118_v58 = vadd.f32 %v1117_v57, %v1116_v56  ;;  %v1119_v59 = vpop.f32.mrb[2].mxu0 }
  0xfc   : > { %v1120_v60 = vpop.f32.mrb[3].mxu0 }
  0xfd   : > { %v1121_v61 = vadd.f32 %v1120_v60, %v1119_v59 }
 0x15e   : > { %v1138_v15 = vpop.f32.mrb[0].mxu1 }
 0x15f   : > { %v1139_v16 = vpop.f32.mrb[1].mxu1 }
 0x160   : > { %v1140_v17 = vadd.f32 %v1139_v16, %v1138_v15  ;;  %v1141_v18 = vpop.f32.mrb[2].mxu1  ;;  %v844_v15 = vsub.s32 1, %v839_v14  ;;  %v836_v16 = vld [vmem:[%s1715_s4] sm:$0x3] }
 0x161   : > { %v1142_v19 = vpop.f32.mrb[3].mxu1 }
 0x162   : > { %v474_v20 = vmax.f32 %v1118_v58, %v1140_v17  ;;  %v1143_v21 = vadd.f32 %v1142_v19, %v1141_v18  ;;  %v1160_v22 = vpop.f32.mrb[4].mxu0  ;;  %v845_v17 = vrot.slane %v836_v16, %v844_v15 }
 0x163   : > { %v1161_v23 = vpop.f32.mrb[5].mxu0 }
 0x164   : > { %v475_v24 = vmax.f32 %v1121_v61, %v1143_v21  ;;  %v1162_v25 = vadd.f32 %v1161_v23, %v1160_v22  ;;  %v1163_v26 = vpop.f32.mrb[6].mxu0 }
 0x165   : > { %v1164_v27 = vpop.f32.mrb[7].mxu0 }
 0x166   : > { %v528_v28 = vmax.f32 %v474_v20, %v1162_v25  ;;  %v1165_v29 = vadd.f32 %v1164_v27, %v1163_v26  ;;  %v840_v26 = vsub.s32 0, %v839_v14 }
 0x168   : > { %v529_v30 = vmax.f32 %v475_v24, %v1165_v29 }
 0x17e   : > { %v1182_v31 = vpop.f32.mrb[4].mxu1 }
 0x17f   : > { %v1183_v32 = vpop.f32.mrb[5].mxu1 }
 0x180   : > { %v1184_v33 = vadd.f32 %v1183_v32, %v1182_v31  ;;  %v1185_v34 = vpop.f32.mrb[6].mxu1 }
 0x181   : > { %v1186_v35 = vpop.f32.mrb[7].mxu1 }
 0x182   : > { %v585_v36 = vmax.f32 %v528_v28, %v1184_v33  ;;  %v1187_v37 = vadd.f32 %v1186_v35, %v1185_v34  ;;  %v1204_v38 = vpop.f32.mrb[8].mxu0  ;;  %v841_v28 = vrot.slane %v836_v16, %v840_v26 }
 0x183   : > { %v1205_v39 = vpop.f32.mrb[9].mxu0 }
 0x184   : > { %v586_v40 = vmax.f32 %v529_v30, %v1187_v37  ;;  %v1206_v41 = vadd.f32 %v1205_v39, %v1204_v38  ;;  %v1207_v42 = vpop.f32.mrb[10].mxu0 }
 0x185   : > { %v1208_v43 = vpop.f32.mrb[11].mxu0 }
 0x186   : > { %v639_v44 = vmax.f32 %v585_v36, %v1206_v41  ;;  %v1209_v45 = vadd.f32 %v1208_v43, %v1207_v42 }
 0x188   : > { %v640_v46 = vmax.f32 %v586_v40, %v1209_v45 }
 0x19e   : > { %v1226_v47 = vpop.f32.mrb[8].mxu1 }
 0x19f   : > { %v1227_v48 = vpop.f32.mrb[9].mxu1 }
 0x1a0   : > { %v1228_v49 = vadd.f32 %v1227_v48, %v1226_v47  ;;  %v1229_v50 = vpop.f32.mrb[10].mxu1 }
 0x1a1   : > { %v1230_v51 = vpop.f32.mrb[11].mxu1 }
 0x1a2   : > { %v693_v52 = vmax.f32 %v639_v44, %v1228_v49  ;;  %v1231_v53 = vadd.f32 %v1230_v51, %v1229_v50  ;;  %v1248_v54 = vpop.f32.mrb[12].mxu0 }
 0x1a3   : > { %v1249_v55 = vpop.f32.mrb[13].mxu0 }
 0x1a4   : > { %v694_v56 = vmax.f32 %v640_v46, %v1231_v53  ;;  %v1250_v57 = vadd.f32 %v1249_v55, %v1248_v54  ;;  %v1251_v58 = vpop.f32.mrb[14].mxu0 }
 0x1a5   : > { %v1252_v59 = vpop.f32.mrb[15].mxu0 }
 0x1a6   : > { %v752_v60 = vmax.f32 %v693_v52, %v1250_v57  ;;  %v1253_v61 = vadd.f32 %v1252_v59, %v1251_v58 }
 0x1a8   : > { %v753_v62 = vmax.f32 %v694_v56, %v1253_v61 }
 0x1be   : > { %v1270_v63 = vpop.f32.mrb[12].mxu1 }
 0x1bf   : > { %v1271_v0 = vpop.f32.mrb[13].mxu1 }
 0x1c0   : > { %v1272_v1 = vadd.f32 %v1271_v0, %v1270_v63  ;;  %v1273_v2 = vpop.f32.mrb[14].mxu1 }
 0x1c1   : > { %v1274_v4 = vpop.f32.mrb[15].mxu1 }
 0x1c2   : > { %v806_v5 = vmax.f32 %v752_v60, %v1272_v1  ;;  %v1275_v6 = vadd.f32 %v1274_v4, %v1273_v2 }
 0x1c4   : > { %v815_v7 = vadd.f32 %v1079_v3, %v806_v5  ;;  %v807_v8 = vmax.f32 %v753_v62, %v1275_v6 }
 0x1c6   : > { %v816_v9 = vadd.f32 %v1079_v3, %v807_v8  ;;  %v817_v10 = vmax.f32 %v815_v7, 0.0 }
 0x1c8   : > { %v818_v11 = vmax.f32 %v816_v9, 0.0 }
 0x1ca   : > { %v819_v12 = vpack.c.bf16 %v818_v11, %v817_v10 }
 0x1cc   : > { %961 = vmatmul.mubr.bf16.vlgmr.msra.gmra.mrb[16].mxu0 %v819_v12 }
 0x29f   : > { %v962_v18 = vpop.f32.mrb[16].mxu0 }
 0x2a0   : > { %v964_v19 = vpop.f32.mrb[17].mxu0  ;;  %v963_v32 = vadd.f32 %v962_v18, %v841_v28 }
 0x2a1   : > { %v965_v20 = vadd.f32 %v964_v19, %v845_v17  ;;  %v966_v21 = vpop.f32.mrb[18].mxu0 }
 0x2a2   : > { %v968_v22 = vpop.f32.mrb[19].mxu0  ;;  %v967_v33 = vadd.f32 %v966_v21, %v841_v28  ;;  %v971_v34 = vmax.f32 %v963_v32, 0.0 }
 0x2a3   : > { %v1096_v23 = vmul.f32 -1.442695, %v965_v20  ;;  %v969_v24 = vadd.f32 %v968_v22, %v845_v17 }
 0x2a4   : > { %v972_v35 = vmax.f32 %v967_v33, 0.0  ;;  %v985_v36 = vsub.f32 %v971_v34, %v817_v10 }
 0x2a5   : > { %1340 = vpow2.f32 %v1096_v23  ;;  %v1097_v25 = vmul.f32 -1.442695, %v969_v24 }
 0x2a6   : > { %v986_v39 = vsub.f32 %v972_v35, %v818_v11 }
 0x2a7   : > { %1342 = vpow2.f32 %v1097_v25 }
 0x2af   : > { %v1341_v27 = vpop.eup %1340 }
 0x2b0   : > { %v979_v29 = vadd.f32 1.0, %v1341_v27 }
 0x2b1   : > { %v1343_v30 = vpop.eup %1342 }
 0x2b2   : > { %1344 = vrcp.f32 %v979_v29  ;;  %v980_v31 = vadd.f32 1.0, %v1343_v30 }
 0x2b4   : > { %1346 = vrcp.f32 %v980_v31 }
 0x2bc   : > { %v1345_v37 = vpop.eup %1344 }
 0x2bd   : > { %v987_v38 = vmul.f32 %v1345_v37, %v985_v36 }
 0x2be   : > { %v1347_v40 = vpop.eup %1346 }
 0x2bf   : > { %v989_v41 = vadd.f32 %v987_v38, %v817_v10  ;;  %v988_v42 = vmul.f32 %v1347_v40, %v986_v39 }
 0x2c1   : > { %991 = vst [vmem:[%s229_s9] sm:$0xff] %v989_v41  ;;  %v990_v43 = vadd.f32 %v988_v42, %v818_v11 }
 0x2c3   : > { %992 = vst [vmem:[%s229_s9 + $0x8] sm:$0xff] %v990_v43 }
 0x2c4 PF: > { %s15_s18 = sadd.s32 1, %s1354_s18  }
 0x2c5   : > { %p12_p4 = scmp.ge.s32.totalorder %s15_s18, 4  }
 0x2c7   :  { %14 = sbr.rel (!%p12_p4) target bundleno = 1 (0x1), region = 70 }

</bundles_post_ra>
